<compile_context>
chip_gen: v7x
topology: tpu7x:2x2x1
jax: 0.10.0
libtpu: 0.0.40
codegen_flags: <defaults>
</compile_context>

<pallas_src>
import functools

import jax
import jax.numpy as jnp
from jax import lax
from jax.experimental import pallas as pl
from jax.experimental.pallas import tpu as pltpu


# ---------------------------------------------------------------------------
# Kernels
# ---------------------------------------------------------------------------
def _reduce_kernel(x_ref, sum_ref, sumsq_ref, *, rows, cols, needs_mask):
    """Per-row-block partial sum(x) / sum(x*x) in f32.

    Grid = (row_blocks ["parallel"], lane_blocks ["arbitrary"]).  The (1,1,1)
    output block for a given row-block stays resident across the lane axis.
    """
    @pl.when(pl.program_id(1) == 0)
    def _():
        sum_ref[...] = jnp.zeros_like(sum_ref)
        sumsq_ref[...] = jnp.zeros_like(sumsq_ref)

    x = x_ref[...].astype(jnp.float32)                 # (TR, TL) tile, f32 math
    if needs_mask:
        # Remainder tiles read padding; zero it out before accumulating.
        tr, tl = x_ref.shape
        r0 = pl.program_id(0) * tr
        c0 = pl.program_id(1) * tl
        rid = lax.broadcasted_iota(jnp.int32, (tr, tl), 0) + r0
        cid = lax.broadcasted_iota(jnp.int32, (tr, tl), 1) + c0
        x = jnp.where((rid < rows) & (cid < cols), x, jnp.float32(0.0))

    sum_ref[...] += jnp.sum(x)
    sumsq_ref[...] += jnp.sum(x * x)


def _normalize_kernel(x_ref, scale_ref, bias_ref, o_ref):
    """y = x * scale + bias with per-row (TR, 1) folded scale/bias (one FMA)."""
    # TODO(synk): scale/bias could be pre-broadcast lane-dense (width 128) to
    # save the per-tile lane splat; pass 2 is HBM-bound so the win is tiny.
    x = x_ref[...].astype(jnp.float32)
    o_ref[...] = (x * scale_ref[...] + bias_ref[...]).astype(o_ref.dtype)


# ---------------------------------------------------------------------------
# Tiling / VMEM budgeting helpers
# ---------------------------------------------------------------------------
def _round_up(x, m):
    return ((x + m - 1) // m) * m


def _sublane_multiple(dtype):
    # f32 -> 8 sublanes per vreg; bf16 -> 16; int8/fp8 -> 32 (sublane packing).
    itemsize = jnp.dtype(dtype).itemsize
    return max(8, 32 // max(itemsize, 1))


def _vmem_capacity_bytes():
    """Physical VMEM of the local TensorCore; conservative fallback if unknown."""
    try:
        cap = getattr(pltpu.get_tpu_info(), "vmem_capacity_bytes", None)
        if cap:
            return int(cap)
    except Exception:
        pass
    return 64 << 20  # safe on every generation (v7x has the smallest VMEM)


def _pick_tiles(rows, cols, itemsize, tile_budget_bytes, sub):
    """Pick (TR, TL): TL a large multiple of 128 (lane-dense DMAs / stores),
    then TR a multiple of the sublane packing, both within the byte budget.
    Uses cdiv-style tiling (no divisibility requirement on rows/cols)."""
    cols_pad = _round_up(cols, 128)
    max_tl = max((tile_budget_bytes // (sub * itemsize)) // 128 * 128, 128)
    tl = min(cols_pad, max_tl)

    rows_pad = _round_up(rows, sub)
    max_tr = max((tile_budget_bytes // (tl * itemsize)) // sub * sub, sub)
    tr = min(rows_pad, max_tr)
    return tr, tl


# ---------------------------------------------------------------------------
# Wrapper
# ---------------------------------------------------------------------------
def my_batch_norm_train(x, gamma, beta, eps=1e-7):
    """x: (N, C, H, W) NCHW.  gamma/beta: (1, C, 1, 1).  Returns (y, E, var)."""
    N, C, H, W = x.shape
    R, HW = N * C, H * W
    x2 = x.reshape(R, HW)

    dtype = x.dtype
    itemsize = jnp.dtype(dtype).itemsize
    sub = _sublane_multiple(dtype)

    # Generation-aware VMEM budget: 25% headroom below physical VMEM so the
    # pipeliner keeps 2-deep double-buffering on v7x (64 MiB) while v5e/v6e
    # (128 MiB) get a ~96 MiB limit and correspondingly larger tiles.
    vmem_cap = _vmem_capacity_bytes()
    vmem_limit = max(int(vmem_cap * 3 // 4), 16 << 20)
    tile_budget = min(vmem_limit // 10, 16 << 20)   # per streamed buffer

    tr, tl = _pick_tiles(R, HW, itemsize, tile_budget, sub)
    gr, gs = pl.cdiv(R, tr), pl.cdiv(HW, tl)
    needs_mask = (R % tr != 0) or (HW % tl != 0)

    x_spec = pl.BlockSpec((tr, tl), lambda r, s: (r, s))
    # (1,1,1) blocks with trailing dims equal to the full array dims.
    part_spec = pl.BlockSpec((1, 1, 1), lambda r, s: (r, 0, 0))

    # ---- Pass 1: per-row-block partial sums (f32), megacore-shardable -------
    sum_p, sumsq_p = pl.pallas_call(
        functools.partial(_reduce_kernel, rows=R, cols=HW, needs_mask=needs_mask),
        grid=(gr, gs),
        in_specs=[x_spec],
        out_specs=(part_spec, part_spec),
        out_shape=(jax.ShapeDtypeStruct((gr, 1, 1), jnp.float32),
                   jax.ShapeDtypeStruct((gr, 1, 1), jnp.float32)),
        compiler_params=pltpu.CompilerParams(
            dimension_semantics=("parallel", "arbitrary"),
            vmem_limit_bytes=vmem_limit,
        ),
    )(x2)

    # ---- Tiny scalar epilogue (plain JAX): stats + folded affine ------------
    n = x.size
    total = jnp.sum(sum_p)
    total_sq = jnp.sum(sumsq_p)
    mean = total / jnp.float32(n)
    var = (total_sq - jnp.float32(n) * mean * mean) / jnp.float32(max(n - 1, 1))
    var = jnp.maximum(var, jnp.float32(0.0))      # guard against cancellation
    inv_std = lax.rsqrt(var + jnp.float32(eps))

    scale_c = gamma.reshape(C).astype(jnp.float32) * inv_std           # (C,)
    bias_c = beta.reshape(C).astype(jnp.float32) - mean * scale_c      # (C,)
    # Row r of the flattened (N*C, HW) view corresponds to channel r % C.
    scale_r = jnp.tile(scale_c, N).reshape(R, 1)
    bias_r = jnp.tile(bias_c, N).reshape(R, 1)

    param_spec = pl.BlockSpec((tr, 1), lambda r, s: (r, 0))

    # ---- Pass 2: per-tile fused multiply-add normalize ----------------------
    y2 = pl.pallas_call(
        _normalize_kernel,
        grid=(gr, gs),
        in_specs=[x_spec, param_spec, param_spec],
        out_specs=x_spec,
        out_shape=jax.ShapeDtypeStruct((R, HW), dtype),
        compiler_params=pltpu.CompilerParams(
            dimension_semantics=("parallel", "parallel"),
            vmem_limit_bytes=vmem_limit,
        ),
    )(x2, scale_r, bias_r)

    return y2.reshape(N, C, H, W), mean, var


class MyBatchNormJax:
    """Thin wrapper mirroring the PyTorch module (training forward + stat EMA)."""

    def __init__(self, n_features, n_dims, momentum=0.999):
        if n_dims == 1:
            shape = (1, n_features)
        elif n_dims == 2:
            shape = (1, n_features, 1, 1)
        else:
            raise ValueError("MyBatchNorm only works for linear layers and 2D convs")
        # TODO(synk): kernel path below implements the n_dims==2 (NCHW) layout only.
        self.momentum = momentum
        self.eps = 1e-7
        self.gamma = jnp.ones(shape, jnp.float32)
        self.beta = jnp.zeros(shape, jnp.float32)
        self.stats_E = None
        self.stats_var = None

    def __call__(self, x):  # training forward
        y, E, var = my_batch_norm_train(x, self.gamma, self.beta, self.eps)
        self._update_stats(E, var)
        return y

    def _update_stats(self, batch_E, batch_var):
        # Matches the PyTorch logic (first call: set, then immediately EMA-blend,
        # which collapses to the batch statistic).
        if self.stats_E is None:
            self.stats_E = batch_E
            self.stats_var = batch_var
        self.stats_E = self.stats_E * (1 - self.momentum) + batch_E * self.momentum
        self.stats_var = self.stats_var * (1 - self.momentum) + batch_var * self.momentum


if __name__ == "__main__":
    key = jax.random.PRNGKey(0)
    N, C, H, W = 2, 4, 16, 16
    x = jax.random.normal(key, (N, C, H, W), dtype=jnp.float32) * 2.0 + 0.5

    bn = MyBatchNormJax(n_features=C, n_dims=2)
    # Deterministic non-trivial affine params so per-channel broadcasting is
    # actually exercised.
    bn.gamma = (jnp.arange(C, dtype=jnp.float32) * 0.1 + 1.0).reshape(1, C, 1, 1)
    bn.beta = (jnp.arange(C, dtype=jnp.float32) * 0.05 - 0.1).reshape(1, C, 1, 1)

    y = bn(x)
    y = jax.block_until_ready(y)

    # Pure-JAX reference.
    E_ref = jnp.mean(x)
    var_ref = jnp.sum((x - E_ref) ** 2) / (x.size - 1)  # unbiased, like torch.var
    y_ref = (x - E_ref) / jnp.sqrt(var_ref + bn.eps) * bn.gamma + bn.beta

    assert y.shape == (N, C, H, W)
    assert jnp.allclose(y, y_ref, atol=1e-5, rtol=1e-5), float(jnp.max(jnp.abs(y - y_ref)))
    assert jnp.allclose(bn.stats_E, E_ref, atol=1e-6, rtol=1e-5)
    assert jnp.allclose(bn.stats_var, var_ref, atol=1e-6, rtol=1e-5)

    print("KERNEL_OK")
</pallas_src>

<mosaic_0001>
module attributes {stable_mosaic.version = 11 : i64} {
  func.func @_reduce_kernel(%arg0: i32, %arg1: i32, %arg2: memref<8x256xf32, #tpu.memory_space<vmem>>, %arg3: memref<1x1x1xf32, #tpu.memory_space<vmem>>, %arg4: memref<1x1x1xf32, #tpu.memory_space<vmem>>) attributes {dimension_semantics = [#tpu.dimension_semantics<parallel>, #tpu.dimension_semantics<arbitrary>], iteration_bounds = array<i64: 1, 1>, scalar_prefetch = 0 : i64, scratch_operands = 0 : i64, tpu.core_type = #tpu.core_type<tc>, window_params = [{transform_indices = @transform_0, window_bounds = array<i64: 8, 256>}, {transform_indices = @transform_1, window_bounds = array<i64: 1, 1, 1>}, {transform_indices = @transform_2, window_bounds = array<i64: 1, 1, 1>}]} {
    %c0_i32 = arith.constant 0 : i32
    %0 = arith.cmpi eq, %arg1, %c0_i32 : i32
    %1 = arith.extui %0 : i1 to i32
    %c0_i32_0 = arith.constant 0 : i32
    %2 = arith.cmpi ne, %1, %c0_i32_0 : i32
    scf.if %2 {
      %cst_15 = arith.constant 0.000000e+00 : f32
      %21 = vector.broadcast %cst_15 : f32 to vector<1x1x1xf32>
      %c0_16 = arith.constant 0 : index
      %c0_17 = arith.constant 0 : index
      %c0_18 = arith.constant 0 : index
      %22 = vector.load %arg3[%c0_16, %c0_17, %c0_18] : memref<1x1x1xf32, #tpu.memory_space<vmem>>, vector<1x1x1xf32>
      tpu.vector_store %arg3[%c0_16, %c0_17, %c0_18], %21 {strides = array<i32>} : memref<1x1x1xf32, #tpu.memory_space<vmem>>, vector<1x1x1xf32>,
      %cst_19 = arith.constant 0.000000e+00 : f32
      %23 = vector.broadcast %cst_19 : f32 to vector<1x1x1xf32>
      %c0_20 = arith.constant 0 : index
      %c0_21 = arith.constant 0 : index
      %c0_22 = arith.constant 0 : index
      %24 = vector.load %arg4[%c0_20, %c0_21, %c0_22] : memref<1x1x1xf32, #tpu.memory_space<vmem>>, vector<1x1x1xf32>
      tpu.vector_store %arg4[%c0_20, %c0_21, %c0_22], %23 {strides = array<i32>} : memref<1x1x1xf32, #tpu.memory_space<vmem>>, vector<1x1x1xf32>,
    } else {
    }
    %c0 = arith.constant 0 : index
    %c0_1 = arith.constant 0 : index
    %3 = vector.load %arg2[%c0, %c0_1] : memref<8x256xf32, #tpu.memory_space<vmem>>, vector<8x256xf32>
    %c0_2 = arith.constant 0 : index
    %c0_3 = arith.constant 0 : index
    %c0_4 = arith.constant 0 : index
    %4 = vector.load %arg3[%c0_2, %c0_3, %c0_4] : memref<1x1x1xf32, #tpu.memory_space<vmem>>, vector<1x1x1xf32>
    %5 = vector.shape_cast %3 : vector<8x256xf32> to vector<1x8x256xf32>
    %cst = arith.constant dense<0.000000e+00> : vector<1xf32>
    %6 = vector.multi_reduction <add>, %5, %cst [1, 2] : vector<1x8x256xf32> to vector<1xf32>
    %7 = vector.shape_cast %6 : vector<1xf32> to vector<1x1x1xf32>
    %8 = vector.extract %7[0, 0, 0] : f32 from vector<1x1x1xf32>
    %9 = vector.broadcast %8 : f32 to vector<1x1x1xf32>
    %10 = arith.addf %4, %9 : vector<1x1x1xf32>
    %c0_5 = arith.constant 0 : index
    %c0_6 = arith.constant 0 : index
    %c0_7 = arith.constant 0 : index
    %11 = vector.load %arg3[%c0_5, %c0_6, %c0_7] : memref<1x1x1xf32, #tpu.memory_space<vmem>>, vector<1x1x1xf32>
    tpu.vector_store %arg3[%c0_5, %c0_6, %c0_7], %10 {strides = array<i32>} : memref<1x1x1xf32, #tpu.memory_space<vmem>>, vector<1x1x1xf32>,
    %c0_8 = arith.constant 0 : index
    %c0_9 = arith.constant 0 : index
    %c0_10 = arith.constant 0 : index
    %12 = vector.load %arg4[%c0_8, %c0_9, %c0_10] : memref<1x1x1xf32, #tpu.memory_space<vmem>>, vector<1x1x1xf32>
    %13 = arith.mulf %3, %3 : vector<8x256xf32>
    %14 = vector.shape_cast %13 : vector<8x256xf32> to vector<1x8x256xf32>
    %cst_11 = arith.constant dense<0.000000e+00> : vector<1xf32>
    %15 = vector.multi_reduction <add>, %14, %cst_11 [1, 2] : vector<1x8x256xf32> to vector<1xf32>
    %16 = vector.shape_cast %15 : vector<1xf32> to vector<1x1x1xf32>
    %17 = vector.extract %16[0, 0, 0] : f32 from vector<1x1x1xf32>
    %18 = vector.broadcast %17 : f32 to vector<1x1x1xf32>
    %19 = arith.addf %12, %18 : vector<1x1x1xf32>
    %c0_12 = arith.constant 0 : index
    %c0_13 = arith.constant 0 : index
    %c0_14 = arith.constant 0 : index
    %20 = vector.load %arg4[%c0_12, %c0_13, %c0_14] : memref<1x1x1xf32, #tpu.memory_space<vmem>>, vector<1x1x1xf32>
    tpu.vector_store %arg4[%c0_12, %c0_13, %c0_14], %19 {strides = array<i32>} : memref<1x1x1xf32, #tpu.memory_space<vmem>>, vector<1x1x1xf32>,
    return
  }
  func.func @transform_0(%arg0: i32, %arg1: i32) -> (i32, i32) {
    %c0_i32 = arith.constant 0 : i32
    return %arg0, %arg1 : i32, i32
  }
  func.func @transform_1(%arg0: i32, %arg1: i32) -> (i32, i32, i32) {
    %c0_i32 = arith.constant 0 : i32
    %c0_i32_0 = arith.constant 0 : i32
    %c0_i32_1 = arith.constant 0 : i32
    return %arg0, %c0_i32, %c0_i32_0 : i32, i32, i32
  }
  func.func @transform_2(%arg0: i32, %arg1: i32) -> (i32, i32, i32) {
    %c0_i32 = arith.constant 0 : i32
    %c0_i32_0 = arith.constant 0 : i32
    %c0_i32_1 = arith.constant 0 : i32
    return %arg0, %c0_i32, %c0_i32_0 : i32, i32, i32
  }
}

</mosaic_0001>

<bundles_post_ra>
// kernel: tpu_custom_call.1
= control target key start
LH: loop header
LB: loop body
LE: loop exit
PB: predicated region body
PF: predicated region fallthrough
CT: control target
= control target key end

     0   :  { %8 = vsyncpa [#allocation3], 0  ;;  %s232_s0 = inlined_call_operand.hbm [shape: f32[8,256], index: 0, kind: input, shape index: {}]   ;;  %s233_s1 = inlined_call_operand.hbm [shape: f32[1,1,1], index: 1, kind: output, shape index: {0}]   ;;  %s234_s2 = inlined_call_operand.hbm [shape: f32[1,1,1], index: 2, kind: output, shape index: {1}]  }
   0x1   :  { %9 = vsyncpa [#allocation4], 0 }
   0x2   :  { %10 = vsyncpa [#allocation7], 0  ;;  %s173_s9 = smov [#allocation2]   ;;  %s101_s13 = scalar_lea.hbm %s232_s0, 256 }
   0x3   :  { %s17_s10 = sshll.u32 %s173_s9, 4  ;;  %p102_p0 = scmp.ne.s32.totalorder %s232_s0, %s101_s13  ;;  %s18_s10 = int_to_ptr.vmem [resolvable:$true] %s17_s10 }
   0x4   :  { %p105_p1 = scmp.lt.u32.totalorder %s101_s13, %s232_s0 }
   0x6   :  { %p107_p2 = pnand %p105_p1, %p102_p0 }
   0x8   :  { %110 = shalt.err (!%p107_p2)
}
   0x9   :  { %s111_s18 = scalar_lea.vmem %s18_s10, 256  ;;  %p116_p4 = scmp.lt.s32.totalorder %s18_s10, %s18_s10 }
   0xa   :  { %p112_p3 = scmp.ne.s32.totalorder %s18_s10, %s111_s18  ;;  %p117_p5 = scmp.lt.s32.totalorder %s111_s18, %s111_s18 }
   0xc   :  { %p118_p6 = por %p117_p5, %p116_p4 }
   0xe   :  { %p119_p7 = pnand %p118_p6, %p112_p3 }
  0x10   :  { %122 = shalt.err (!%p119_p7)
}
  0x11   :  { %20 = dma.hbm_to_vmem [thread:$0]  %s232_s0, 256, %s18_s10, [#allocation3]  }
  0x12   :  { %167 = dma.done.wait [#allocation3], 256  }
  0x13   :  { %168 = vsyncadd [#allocation3], 4294967040  ;;  %vm28_vm0 = vcmask 0   ;;  %v174_v0 = vmov 0.0   ;;  %v31_v1 = vld [vmem:[#allocation2] sm:$0xff]  ;;  %v32_v2 = vld [vmem:[#allocation2 + $0x8] sm:$0xff] }
  0x14   :  { %29 = vst.msk [vmem:[#allocation5] sm:$0x1] %vm28_vm0, %v174_v0  ;;  %30 = vst.msk [vmem:[#allocation6] sm:$0x1] %vm28_vm0, %v174_v0  ;;  %v34_v3 = vadd.f32 %v32_v2, %v31_v1  ;;  %v49_v4 = vmul.f32 %v31_v1, %v31_v1  ;;  %v50_v5 = vmul.f32 %v32_v2, %v32_v2  ;;  %s175_s0 = smov [#allocation5]   ;;  %s176_s23 = smov [#allocation6]  }
  0x15   :  { %s70_s21 = sshll.u32 %s175_s0, 4  ;;  %s80_s24 = sshll.u32 %s176_s23, 4  ;;  %s71_s21 = int_to_ptr.vmem [resolvable:$true] %s70_s21  ;;  %s81_s24 = int_to_ptr.vmem [resolvable:$true] %s80_s24 }
  0x16   :  { %35 = vadd.xlane.f32.xlu0 %v34_v3  ;;  %v51_v6 = vadd.f32 %v50_v5, %v49_v4  ;;  %s123_s26 = scalar_lea.vmem %s71_s21, 16  ;;  %s127_s27 = scalar_lea.vmem %s71_s21, 32 }
  0x17   :  { %p124_p8 = scmp.ne.s32.totalorder %s71_s21, %s123_s26  ;;  %p128_p9 = scmp.lt.s32.totalorder %s71_s21, %s71_s21 }
  0x18   :  { %p129_p10 = scmp.lt.s32.totalorder %s127_s27, %s123_s26 }
  0x1a   :  { %52 = vadd.xlane.f32.xlu0 %v51_v6  ;;  %p130_p11 = por %p129_p10, %p128_p9 }
  0x1b   :  { %v33_v21 = vld [vmem:[#allocation5] sm:$0x1]  ;;  %v48_v24 = vld [vmem:[#allocation6] sm:$0x1] }
  0x1c   :  { %p131_p12 = pnand %p130_p11, %p124_p8 }
  0xa3   :  { %v36_v7 = vpop.xlane.xlu0 %35 }
  0xa4   :  { %v37_v8 = vrot.slane %v36_v7, 4 }
  0xa6   :  { %v38_v9 = vadd.f32 %v37_v8, %v36_v7 }
  0xa7   :  { %v53_v10 = vpop.xlane.xlu0 %52 }
  0xa8   :  { %v39_v11 = vrot.slane %v38_v9, 2  ;;  %v54_v12 = vrot.slane %v53_v10, 4 }
  0xaa   :  { %v55_v13 = vadd.f32 %v54_v12, %v53_v10  ;;  %v40_v14 = vadd.f32 %v39_v11, %v38_v9 }
  0xac   :  { %v56_v15 = vrot.slane %v55_v13, 2  ;;  %v41_v16 = vrot.slane %v40_v14, 1 }
  0xae   :  { %v57_v17 = vadd.f32 %v56_v15, %v55_v13  ;;  %v42_v18 = vadd.f32 %v41_v16, %v40_v14 }
  0xb0   :  { %93 = vpush %v42_v18  ;;  %v58_v19 = vrot.slane %v57_v17, 1 }
  0xb2   :  { %v59_v20 = vadd.f32 %v58_v19, %v57_v17 }
  0xb4   :  { %95 = vpush %v59_v20 }
  0xe1   :  { %s94_s22 = spop %93 }
  0xe2   :  { %v44_v22 = vstv %s94_s22 }
  0xe3   :  { %v45_v23 = vadd.f32 %v44_v22, %v33_v21 }
  0xe5   :  { %47 = vst.msk [vmem:[#allocation5] sm:$0x1] %vm28_vm0, %v45_v23  ;;  %s96_s25 = spop %95 }
  0xe6   :  { %v61_v25 = vstv %s96_s25 }
  0xe7   :  { %134 = shalt.err (!%p131_p12)
}
  0xe8   :  { %s135_s30 = scalar_lea.hbm %s233_s1, 16 }
  0xe9   :  { %p136_p13 = scmp.ne.s32.totalorder %s233_s1, %s135_s30  ;;  %p139_p0 = scmp.lt.u32.totalorder %s135_s30, %s233_s1 }
  0xeb   :  { %p141_p1 = pnand %p139_p0, %p136_p13 }
  0xed   :  { %144 = shalt.err (!%p141_p1)
}
  0xee   :  { %73 = dma.vmem_to_hbm [thread:$0]  %s71_s21, 16, %s233_s1, [#allocation4]   ;;  %v62_v26 = vadd.f32 %v61_v25, %v48_v24 }
  0xef   :  { %s145_s9 = scalar_lea.vmem %s81_s24, 16  ;;  %s149_s10 = scalar_lea.vmem %s81_s24, 32 }
  0xf0   :  { %63 = vst.msk [vmem:[#allocation6] sm:$0x1] %vm28_vm0, %v62_v26  ;;  %p146_p2 = scmp.ne.s32.totalorder %s81_s24, %s145_s9  ;;  %p150_p3 = scmp.lt.s32.totalorder %s81_s24, %s81_s24 }
  0xf1   :  { %p151_p4 = scmp.lt.s32.totalorder %s149_s10, %s145_s9 }
  0xf3   :  { %p152_p5 = por %p151_p4, %p150_p3 }
  0xf5   :  { %p153_p6 = pnand %p152_p5, %p146_p2 }
  0xf7   :  { %156 = shalt.err (!%p153_p6)
}
  0xf8   :  { %s157_s13 = scalar_lea.hbm %s234_s2, 16 }
  0xf9   :  { %p158_p7 = scmp.ne.s32.totalorder %s234_s2, %s157_s13  ;;  %p161_p8 = scmp.lt.u32.totalorder %s157_s13, %s234_s2 }
  0xfb   :  { %p163_p9 = pnand %p161_p8, %p158_p7 }
  0xfd   :  { %166 = shalt.err (!%p163_p9)
}
  0xfe   :  { %83 = dma.vmem_to_hbm [thread:$0]  %s81_s24, 16, %s234_s2, [#allocation7]  }
  0xff   :  { %169 = dma.done.wait [#allocation4], 16  }
 0x100   :  { %170 = vsyncadd [#allocation4], 4294967280 }
 0x101   :  { %171 = dma.done.wait [#allocation7], 16  }
 0x102   :  { %172 = vsyncadd [#allocation7], 4294967280 }
 0x103   :  { %90 = vsyncpa [#allocation3], 1 }
 0x104   :  { %91 = vsyncpa [#allocation4], 1 }
 0x105   :  { %92 = vsyncpa [#allocation7], 1 }

</bundles_post_ra>
